<compile_context>
chip_gen: v6e
topology: v6e:2x2x1
jax: 0.10.0
libtpu: 0.0.40
codegen_flags: <defaults>
</compile_context>

<pallas_src>
import jax
import jax.numpy as jnp
from jax.experimental import pallas as pl
from jax.experimental.pallas import tpu as pltpu


def _round_up(v, m):
    return (v + m - 1) // m * m


def mixture_of_experts(node_feat, batch, num_graphs,
                       w_experts, b_experts, w_gate, b_gate,
                       *, block_b=128, weight_dtype=jnp.bfloat16):
    """Fused MoE forward.

    node_feat : [N, F]      per-node features (cat([z, pos]))
    batch     : [N] int32   graph id per node (contiguous per graph not required)
    w_experts : [E, F, D]   expert weights, b_experts: [E, D]
    w_gate    : [F, E]      gating weights,  b_gate:   [1, E]
    returns   : [num_graphs, D]
    """
    N, F = node_feat.shape
    E, _, D = w_experts.shape
    LANE, SUB = 128, 8

    B_pad = _round_up(max(num_graphs, SUB), SUB)
    TB = min(_round_up(block_b, SUB), B_pad)
    B_pad = _round_up(B_pad, TB)
    N_pad = _round_up(N, SUB)
    F_pad = _round_up(F, LANE)
    D_pad = _round_up(D, LANE)

    f32 = jnp.float32

    # --- mean-pool matrix (pooling happens inside the kernel as one matmul) ---
    counts = jax.ops.segment_sum(jnp.ones((N,), f32), batch, num_segments=num_graphs)
    one_hot = (batch[None, :] == jnp.arange(num_graphs)[:, None]).astype(f32)      # [B, N]
    pool = one_hot / jnp.maximum(counts, 1.0)[:, None]
    pool_pad = jnp.zeros((B_pad, N_pad), f32).at[:num_graphs, :N].set(pool)

    # --- padded node features ---
    x_pad = jnp.zeros((N_pad, F_pad), f32).at[:N, :F].set(node_feat.astype(f32))

    # --- fused expert weight slab: pad F/D first, then fold E into lanes ---
    we = jnp.zeros((E, F_pad, D_pad), f32).at[:, :F, :D].set(w_experts.astype(f32))
    we = we.transpose(1, 0, 2).reshape(F_pad, E * D_pad).astype(weight_dtype)       # [F, E*D]
    be = jnp.zeros((E, D_pad), f32).at[:, :D].set(b_experts.astype(f32))            # [E, D]
    wg = jnp.zeros((F_pad, E), f32).at[:F, :].set(w_gate.astype(f32))               # [F, E]
    bg = b_gate.reshape(1, E).astype(f32)                                           # [1, E]

    def kernel(pool_ref, x_ref, we_ref, be_ref, wg_ref, bg_ref, out_ref):
        # fused per-graph mean pooling: [TB, N] @ [N, F] -> [TB, F]
        h = jnp.dot(pool_ref[...], x_ref[...], preferred_element_type=jnp.float32)

        # gating head: linear + softmax over experts (f32 math)
        logits = jnp.dot(h, wg_ref[...], preferred_element_type=jnp.float32) + bg_ref[...]
        m = jnp.max(logits, axis=-1, keepdims=True)
        p = jnp.exp(logits - m)
        s = jnp.sum(p, axis=-1, keepdims=True)
        w = p * pl.reciprocal(s, approx=True)                       # [TB, E]

        # ALL experts in one MXU call: [TB, F] @ [F, E*D] -> [TB, E*D]
        eo = jnp.dot(h.astype(we_ref.dtype), we_ref[...],
                     preferred_element_type=jnp.float32)
        eo = eo.reshape(h.shape[0], E, D_pad)                        # [TB, E, D]

        # weighted reduce over experts (whole-vreg multiply, XLU reduce)
        mix = jnp.sum(eo * w[:, :, None], axis=1)                    # [TB, D]
        # per-expert biases folded as one [TB,E] @ [E,D] matmul
        mix = mix + jnp.dot(w, be_ref[...], preferred_element_type=jnp.float32)
        out_ref[...] = mix.astype(out_ref.dtype)

    out = pl.pallas_call(
        kernel,
        out_shape=jax.ShapeDtypeStruct((B_pad, D_pad), f32),
        grid=(B_pad // TB,),
        in_specs=[
            pl.BlockSpec((TB, N_pad), lambda i: (i, 0)),
            pl.BlockSpec((N_pad, F_pad), lambda i: (0, 0)),
            pl.BlockSpec((F_pad, E * D_pad), lambda i: (0, 0)),
            pl.BlockSpec((E, D_pad), lambda i: (0, 0)),
            pl.BlockSpec((F_pad, E), lambda i: (0, 0)),
            pl.BlockSpec((1, E), lambda i: (0, 0)),
        ],
        out_specs=pl.BlockSpec((TB, D_pad), lambda i: (i, 0)),
        compiler_params=pltpu.CompilerParams(dimension_semantics=("parallel",)),
    )(pool_pad, x_pad, we, be, wg, bg)

    return out[:num_graphs, :D]


if __name__ == "__main__":
    key = jax.random.PRNGKey(0)
    N, B, E, D = 16, 4, 4, 8      # nodes, graphs, experts, expert output dim
    Fg = 4                        # feature dim: [z, px, py, pz]
    k1, k2, k3, k4, k5, k6 = jax.random.split(key, 6)

    # synthetic graph batch (deterministic)
    z = jax.random.randint(k1, (N,), 1, 10)                    # data.x (atomic numbers)
    pos = jax.random.normal(k2, (N, 3), jnp.float32)           # data.pos
    batch = jnp.repeat(jnp.arange(B), N // B)                  # data.batch

    # x = torch.cat([data.x.unsqueeze(1), data.pos], dim=-1)  -> [N, 4]
    node_feat = jnp.concatenate([z.astype(jnp.float32)[:, None], pos], axis=-1)

    # deterministic synthetic parameters (stand-ins for external modules)
    w_experts = jax.random.normal(k3, (E, Fg, D), jnp.float32) * 0.1
    b_experts = jax.random.normal(k4, (E, D), jnp.float32) * 0.01
    w_gate = jax.random.normal(k5, (Fg, E), jnp.float32) * 0.1
    b_gate = jax.random.normal(k6, (1, E), jnp.float32) * 0.01

    out = mixture_of_experts(node_feat, batch, B,
                             w_experts, b_experts, w_gate, b_gate)
    jax.block_until_ready(out)

    # pure-JAX f32 reference (mirrors the PyTorch forward on the stand-ins)
    sums = jax.ops.segment_sum(node_feat, batch, num_segments=B)
    counts = jax.ops.segment_sum(jnp.ones((N, 1), jnp.float32), batch, num_segments=B)
    pooled = sums / counts                                             # [B, 4]
    logits = pooled @ w_gate + b_gate
    weights = jax.nn.softmax(logits, axis=-1)                          # [B, E]
    expert_outputs = jnp.stack(
        [pooled @ w_experts[e] + b_experts[e] for e in range(E)], axis=2)  # [B, D, E]
    ref = jnp.sum(expert_outputs * weights[:, None, :], axis=2)        # [B, D]

    assert out.shape == (B, D)
    # tolerance sized for bf16 expert weights + approx-reciprocal softmax
    # (structural errors would be O(0.1-1), far outside this band)
    assert jnp.allclose(out, ref, atol=5e-2, rtol=5e-2), "kernel/reference mismatch"
    print("KERNEL_OK")
</pallas_src>

<mosaic_0001>
module attributes {stable_mosaic.version = 11 : i64} {
  func.func @kernel(%arg0: i32, %arg1: memref<8x16xf32, #tpu.memory_space<vmem>>, %arg2: memref<16x128xf32, #tpu.memory_space<vmem>>, %arg3: memref<128x512xbf16, #tpu.memory_space<vmem>>, %arg4: memref<4x128xf32, #tpu.memory_space<vmem>>, %arg5: memref<128x4xf32, #tpu.memory_space<vmem>>, %arg6: memref<1x4xf32, #tpu.memory_space<vmem>>, %arg7: memref<8x128xf32, #tpu.memory_space<vmem>>) attributes {dimension_semantics = [#tpu.dimension_semantics<parallel>], iteration_bounds = array<i64: 1>, scalar_prefetch = 0 : i64, scratch_operands = 0 : i64, tpu.core_type = #tpu.core_type<tc>, window_params = [{transform_indices = @transform_0, window_bounds = array<i64: 8, 16>}, {pipeline_mode = #tpu.pipeline_mode<synchronous>, transform_indices = @transform_1, window_bounds = array<i64: 16, 128>}, {pipeline_mode = #tpu.pipeline_mode<synchronous>, transform_indices = @transform_2, window_bounds = array<i64: 128, 512>}, {pipeline_mode = #tpu.pipeline_mode<synchronous>, transform_indices = @transform_3, window_bounds = array<i64: 4, 128>}, {pipeline_mode = #tpu.pipeline_mode<synchronous>, transform_indices = @transform_4, window_bounds = array<i64: 128, 4>}, {pipeline_mode = #tpu.pipeline_mode<synchronous>, transform_indices = @transform_5, window_bounds = array<i64: 1, 4>}, {transform_indices = @transform_6, window_bounds = array<i64: 8, 128>}]} {
    %c0 = arith.constant 0 : index
    %c0_0 = arith.constant 0 : index
    %0 = vector.load %arg1[%c0, %c0_0] : memref<8x16xf32, #tpu.memory_space<vmem>>, vector<8x16xf32>
    %c0_1 = arith.constant 0 : index
    %c0_2 = arith.constant 0 : index
    %1 = vector.load %arg2[%c0_1, %c0_2] : memref<16x128xf32, #tpu.memory_space<vmem>>, vector<16x128xf32>
    %cst = arith.constant dense<0.000000e+00> : vector<8x128xf32>
    %2 = tpu.matmul %0, %1, %cst {dimension_numbers = #tpu.dot_dimension_numbers<[1], [0], [0], [1], [0, 0, 1, 1], [], []>} : vector<8x16xf32>, vector<16x128xf32>, vector<8x128xf32> -> vector<8x128xf32>
    %c0_3 = arith.constant 0 : index
    %c0_4 = arith.constant 0 : index
    %3 = vector.load %arg5[%c0_3, %c0_4] : memref<128x4xf32, #tpu.memory_space<vmem>>, vector<128x4xf32>
    %cst_5 = arith.constant dense<0.000000e+00> : vector<8x4xf32>
    %4 = tpu.matmul %2, %3, %cst_5 {dimension_numbers = #tpu.dot_dimension_numbers<[1], [0], [0], [1], [0, 0, 1, 1], [], []>} : vector<8x128xf32>, vector<128x4xf32>, vector<8x4xf32> -> vector<8x4xf32>
    %c0_6 = arith.constant 0 : index
    %c0_7 = arith.constant 0 : index
    %5 = vector.load %arg6[%c0_6, %c0_7] : memref<1x4xf32, #tpu.memory_space<vmem>>, vector<1x4xf32>
    %6 = vector.broadcast %5 : vector<1x4xf32> to vector<8x4xf32>
    %7 = arith.addf %4, %6 : vector<8x4xf32>
    %cst_8 = arith.constant dense<0xFF800000> : vector<8xf32>
    %8 = vector.multi_reduction <maximumf>, %7, %cst_8 [1] : vector<8x4xf32> to vector<8xf32>
    %9 = vector.shape_cast %8 : vector<8xf32> to vector<8x1xf32>
    %10 = vector.broadcast %9 : vector<8x1xf32> to vector<8x4xf32>
    %11 = arith.subf %7, %10 : vector<8x4xf32>
    %12 = math.exp %11 : vector<8x4xf32>
    %cst_9 = arith.constant dense<0.000000e+00> : vector<8xf32>
    %13 = vector.multi_reduction <add>, %12, %cst_9 [1] : vector<8x4xf32> to vector<8xf32>
    %14 = vector.shape_cast %13 : vector<8xf32> to vector<8x1xf32>
    %15 = tpu.reciprocal %14 {approx = true} : vector<8x1xf32> -> vector<8x1xf32>
    %16 = vector.broadcast %15 : vector<8x1xf32> to vector<8x4xf32>
    %17 = arith.mulf %12, %16 : vector<8x4xf32>
    %18 = arith.truncf %2 : vector<8x128xf32> to vector<8x128xbf16>
    %c0_10 = arith.constant 0 : index
    %c0_11 = arith.constant 0 : index
    %19 = vector.load %arg3[%c0_10, %c0_11] : memref<128x512xbf16, #tpu.memory_space<vmem>>, vector<128x512xbf16>
    %cst_12 = arith.constant dense<0.000000e+00> : vector<8x512xf32>
    %20 = tpu.matmul %18, %19, %cst_12 {dimension_numbers = #tpu.dot_dimension_numbers<[1], [0], [0], [1], [0, 0, 1, 1], [], []>} : vector<8x128xbf16>, vector<128x512xbf16>, vector<8x512xf32> -> vector<8x512xf32>
    %21 = vector.shape_cast %20 : vector<8x512xf32> to vector<8x4x128xf32>
    %22 = vector.shape_cast %17 : vector<8x4xf32> to vector<8x4x1xf32>
    %23 = vector.broadcast %22 : vector<8x4x1xf32> to vector<8x4x128xf32>
    %24 = arith.mulf %21, %23 : vector<8x4x128xf32>
    %cst_13 = arith.constant dense<0.000000e+00> : vector<8x128xf32>
    %25 = vector.multi_reduction <add>, %24, %cst_13 [1] : vector<8x4x128xf32> to vector<8x128xf32>
    %c0_14 = arith.constant 0 : index
    %c0_15 = arith.constant 0 : index
    %26 = vector.load %arg4[%c0_14, %c0_15] : memref<4x128xf32, #tpu.memory_space<vmem>>, vector<4x128xf32>
    %cst_16 = arith.constant dense<0.000000e+00> : vector<8x128xf32>
    %27 = tpu.matmul %17, %26, %cst_16 {dimension_numbers = #tpu.dot_dimension_numbers<[1], [0], [0], [1], [0, 0, 1, 1], [], []>} : vector<8x4xf32>, vector<4x128xf32>, vector<8x128xf32> -> vector<8x128xf32>
    %28 = arith.addf %25, %27 : vector<8x128xf32>
    %c0_17 = arith.constant 0 : index
    %c0_18 = arith.constant 0 : index
    %29 = vector.load %arg7[%c0_17, %c0_18] : memref<8x128xf32, #tpu.memory_space<vmem>>, vector<8x128xf32>
    tpu.vector_store %arg7[%c0_17, %c0_18], %28 {strides = array<i32>} : memref<8x128xf32, #tpu.memory_space<vmem>>, vector<8x128xf32>,
    return
  }
  func.func @transform_0(%arg0: i32) -> (i32, i32) {
    %c0_i32 = arith.constant 0 : i32
    %c0_i32_0 = arith.constant 0 : i32
    return %arg0, %c0_i32 : i32, i32
  }
  func.func @transform_1(%arg0: i32) -> (i32, i32) {
    %c0_i32 = arith.constant 0 : i32
    %c0_i32_0 = arith.constant 0 : i32
    %c0_i32_1 = arith.constant 0 : i32
    return %c0_i32, %c0_i32_0 : i32, i32
  }
  func.func @transform_2(%arg0: i32) -> (i32, i32) {
    %c0_i32 = arith.constant 0 : i32
    %c0_i32_0 = arith.constant 0 : i32
    %c0_i32_1 = arith.constant 0 : i32
    return %c0_i32, %c0_i32_0 : i32, i32
  }
  func.func @transform_3(%arg0: i32) -> (i32, i32) {
    %c0_i32 = arith.constant 0 : i32
    %c0_i32_0 = arith.constant 0 : i32
    %c0_i32_1 = arith.constant 0 : i32
    return %c0_i32, %c0_i32_0 : i32, i32
  }
  func.func @transform_4(%arg0: i32) -> (i32, i32) {
    %c0_i32 = arith.constant 0 : i32
    %c0_i32_0 = arith.constant 0 : i32
    %c0_i32_1 = arith.constant 0 : i32
    return %c0_i32, %c0_i32_0 : i32, i32
  }
  func.func @transform_5(%arg0: i32) -> (i32, i32) {
    %c0_i32 = arith.constant 0 : i32
    %c0_i32_0 = arith.constant 0 : i32
    %c0_i32_1 = arith.constant 0 : i32
    return %c0_i32, %c0_i32_0 : i32, i32
  }
  func.func @transform_6(%arg0: i32) -> (i32, i32) {
    %c0_i32 = arith.constant 0 : i32
    %c0_i32_0 = arith.constant 0 : i32
    return %arg0, %c0_i32 : i32, i32
  }
}

</mosaic_0001>

<bundles_post_ra>
// kernel: tpu_custom_call.1
= control target key start
LH: loop header
LB: loop body
LE: loop exit
PB: predicated region body
PF: predicated region fallthrough
CT: control target
= control target key end

     0   :  { %11 = vsyncpa [#allocation3], 0  ;;  %s1213_s0 = inlined_call_operand.vmem [shape: f32[8,16], index: 0, kind: input, shape index: {}]   ;;  %s1214_s1 = inlined_call_operand.vmem [shape: f32[16,128], index: 1, kind: input, shape index: {}]   ;;  %s1215_s2 = inlined_call_operand.hbm [shape: bf16[128,512], index: 2, kind: input, shape index: {}]   ;;  %s1216_s3 = inlined_call_operand.vmem [shape: f32[4,128], index: 3, kind: input, shape index: {}]   ;;  %s1217_s4 = inlined_call_operand.vmem [shape: f32[128,4], index: 4, kind: input, shape index: {}]   ;;  %s1218_s5 = inlined_call_operand.vmem [shape: f32[1,4], index: 5, kind: input, shape index: {}]   ;;  %s1219_s6 = inlined_call_operand.hbm [shape: f32[8,128], index: 6, kind: output, shape index: {}]  }
   0x1   :  { %12 = vsyncpa [#allocation4], 0  ;;  %s1042_s21 = smov [#allocation2]  }
   0x2   :  { %s22_s22 = sshll.u32 %s1042_s21, 4  ;;  %s23_s22 = int_to_ptr.vmem [resolvable:$true] %s22_s22 }
   0x3   :  { %s1006_s23 = scalar_lea.vmem %s23_s22, 4096  ;;  %p1011_p1 = scmp.lt.s32.totalorder %s23_s22, %s23_s22 }
   0x4   :  { %p1007_p0 = scmp.ne.s32.totalorder %s23_s22, %s1006_s23  ;;  %p1012_p2 = scmp.lt.s32.totalorder %s1006_s23, %s1006_s23 }
   0x6   :  { %p1013_p3 = por %p1012_p2, %p1011_p1 }
   0x8   :  { %p1014_p4 = pnand %p1013_p3, %p1007_p0 }
   0xa   :  { %1017 = shalt.err (!%p1014_p4)
}
   0xb   :  { %s1043_s24 = smov 256   ;;  %s1044_s25 = smov 16  }
   0xc   :  { %28 = dma.hbm_to_vmem [thread:$0]  %s1215_s2, 4096, %s23_s22, [#allocation3], %s1043_s24, %s1043_s24, %s1044_s25  }
   0xd   :  { %1038 = dma.done.wait [#allocation3], 4096  }
   0xe   :  { %1039 = vsyncadd [#allocation3], 4294963200  ;;  %v1045_v0 = vmov 0.0   ;;  %vm1046_vm0 = vmmov 0   ;;  %v41_v1 = vld [vmem:[%s1214_s1 + $0x8] sm:$0xff]  ;;  %v40_v2 = vld [vmem:[%s1214_s1] sm:$0xff] }
   0xf   :  { %890 = vmatprep.subr.mxu0 %v1045_v0  ;;  %894 = vmatprep.mubr.msk.f32.mxu0 %vm1046_vm0, %v1045_v0  ;;  %v39_v3 = vld [vmem:[%s1213_s0] sm:$0xff]  ;;  %vm42_vm1 = vcmask 130048   ;;  %v131_v4 = vld [vmem:[%s1217_s4 + $0x78] sm:$0xff]  ;;  %v130_v5 = vld [vmem:[%s1217_s4 + $0x70] sm:$0xff]  ;;  %v1047_v37 = vmov 0   ;;  %vm209_vm2 = vcmask 31744  }
  0x10   :  { %897 = vmatprep.subr.mxu1 %v1045_v0  ;;  %929 = vmatprep.mubr.msk.f32.mxu1 %vm1046_vm0, %v1045_v0  ;;  %v946_v6 = vld [vmem:[#allocation2 + $0xe0] ss:$16 sps:$4 sm:$0xff]   ;;  %v948_v7 = vld [vmem:[#allocation2 + $0xe4] ss:$16 sps:$4 sm:$0xff]   ;;  %v129_v8 = vld [vmem:[%s1217_s4 + $0x68] sm:$0xff]  ;;  %vm628_vm3 = vcmask 1043456  }
  0x11   :  { %891 = vmatpush3.msra.mxu0 %v41_v1  ;;  %898 = vmatpush3.msra.mxu1 %v131_v4  ;;  %v951_v9 = vld [vmem:[#allocation2 + $0xc4] ss:$16 sps:$4 sm:$0xff]   ;;  %v949_v11 = vld [vmem:[#allocation2 + $0xc0] ss:$16 sps:$4 sm:$0xff]   ;;  %v127_v12 = vld [vmem:[%s1217_s4 + $0x58] sm:$0xff]  ;;  %v501_v4 = vlaneseq  ;;  %vm795_vm4 = vcmask 1041409  }
  0x12   :  { %892 = vmatprep.subr.mxu0 %v1045_v0  ;;  %899 = vmatprep.subr.mxu1 %v1045_v0  ;;  %v128_v10 = vld [vmem:[%s1217_s4 + $0x60] sm:$0xff]  ;;  %v126_v14 = vld [vmem:[%s1217_s4 + $0x50] sm:$0xff]  ;;  %v125_v16 = vld [vmem:[%s1217_s4 + $0x48] sm:$0xff]  ;;  %vm798_vm5 = vcmask 1042434   ;;  %vm801_vm6 = vcmask 1043459   ;;  %vm804_vm7 = vcmask 1044484  }
  0x13   :  { %893 = vmatpush3.msra.mxu0 %v40_v2  ;;  %900 = vmatpush3.msra.mxu1 %v130_v5  ;;  %v954_v13 = vld [vmem:[#allocation2 + $0xa4] ss:$16 sps:$4 sm:$0xff]   ;;  %v952_v15 = vld [vmem:[#allocation2 + $0xa0] ss:$16 sps:$4 sm:$0xff]   ;;  %v123_v20 = vld [vmem:[%s1217_s4 + $0x38] sm:$0xff]  ;;  %vm807_vm8 = vcmask 1045509  }
  0x14   :  { %895 = vmatmul.mubr.msk.f32.vlgmr.msra.gmra.mxu0 %vm42_vm1, %v39_v3  ;;  %414 = vmatprep.subr.bf16.mxu0 %v948_v7  ;;  %v957_v17 = vld [vmem:[#allocation2 + $0x84] ss:$16 sps:$4 sm:$0xff]   ;;  %v955_v19 = vld [vmem:[#allocation2 + $0x80] ss:$16 sps:$4 sm:$0xff]   ;;  %v121_v24 = vld [vmem:[%s1217_s4 + $0x28] sm:$0xff]  ;;  %vm810_vm9 = vcmask 1046534  }
  0x15   :  { %901 = vmatprep.subr.mxu1 %v1045_v0  ;;  %415 = vmatpush1.bf16.msra.mxu0 %v946_v6  ;;  %v124_v18 = vld [vmem:[%s1217_s4 + $0x40] sm:$0xff]  ;;  %v122_v22 = vld [vmem:[%s1217_s4 + $0x30] sm:$0xff]  ;;  %v119_v28 = vld [vmem:[%s1217_s4 + $0x18] sm:$0xff]  ;;  %v1048_v2 = vmov 1983009808   ;;  %v1175_v6 = vshrl.u32 %v501_v4, 7 }
  0x16   :  { %902 = vmatpush3.msra.mxu1 %v129_v8  ;;  %416 = vmatprep.subr.bf16.mxu0 %v951_v9  ;;  %v960_v21 = vld [vmem:[#allocation2 + $0x64] ss:$16 sps:$4 sm:$0xff]   ;;  %v958_v23 = vld [vmem:[#allocation2 + $0x60] ss:$16 sps:$4 sm:$0xff]   ;;  %v117_v32 = vld [vmem:[%s1217_s4 + $0x8] sm:$0xff]  ;;  %v499_v3 = vunpack.c.l.s4 %v1048_v2  ;;  %vm813_vm10 = vcmask 1047559  }
  0x17   :  { %903 = vmatprep.subr.mxu1 %v1045_v0  ;;  %v963_v25 = vld [vmem:[#allocation2 + $0x44] ss:$16 sps:$4 sm:$0xff]   ;;  %v961_v27 = vld [vmem:[#allocation2 + $0x40] ss:$16 sps:$4 sm:$0xff]   ;;  %v972_v36 = vld [vmem:[#allocation2 + $0xec] ss:$16 sps:$4 sm:$0xff]   ;;  %446 = vmatprep.mubr.bf16.mxu0 %v1047_v37 }
  0x18   :  { %904 = vmatpush3.msra.mxu1 %v128_v10  ;;  %v120_v26 = vld [vmem:[%s1217_s4 + $0x20] sm:$0xff]  ;;  %v118_v30 = vld [vmem:[%s1217_s4 + $0x10] sm:$0xff]  ;;  %v970_v38 = vld [vmem:[#allocation2 + $0xe8] ss:$16 sps:$4 sm:$0xff]   ;;  %v500_v5 = vunpack.c.0.s8 %v499_v3 }
  0x19   :  { %905 = vmatprep.subr.mxu1 %v1045_v0  ;;  %417 = vmatpush1.bf16.msra.mxu0 %v949_v11  ;;  %v966_v29 = vld [vmem:[#allocation2 + $0x24] ss:$16 sps:$4 sm:$0xff]   ;;  %v964_v31 = vld [vmem:[#allocation2 + $0x20] ss:$16 sps:$4 sm:$0xff]   ;;  %v975_v39 = vld [vmem:[#allocation2 + $0xcc] ss:$16 sps:$4 sm:$0xff]  }
  0x1a   :  { %906 = vmatpush3.msra.mxu1 %v127_v12  ;;  %418 = vmatprep.subr.bf16.mxu0 %v954_v13  ;;  %v969_v33 = vld [vmem:[#allocation2 + $0x4] ss:$16 sps:$4 sm:$0xff]   ;;  %v967_v35 = vld [vmem:[#allocation2] ss:$16 sps:$4 sm:$0xff]   ;;  %v973_v43 = vld [vmem:[#allocation2 + $0xc8] ss:$16 sps:$4 sm:$0xff]   ;;  %v503_v10 = vsub.s32 %v500_v5, %v1175_v6 }
  0x1b   :  { %907 = vmatprep.subr.mxu1 %v1045_v0  ;;  %v116_v34 = vld [vmem:[%s1217_s4] sm:$0xff]  ;;  %v978_v44 = vld [vmem:[#allocation2 + $0xac] ss:$16 sps:$4 sm:$0xff]   ;;  %v976_v45 = vld [vmem:[#allocation2 + $0xa8] ss:$16 sps:$4 sm:$0xff]  }
  0x1c   :  { %908 = vmatpush3.msra.mxu1 %v126_v14  ;;  %v981_v46 = vld [vmem:[#allocation2 + $0x8c] ss:$16 sps:$4 sm:$0xff]   ;;  %v979_v47 = vld [vmem:[#allocation2 + $0x88] ss:$16 sps:$4 sm:$0xff]   ;;  %v833_v56 = vld [vmem:[%s1218_s5] ss:$0 sm:$0xff] }
  0x1d   :  { %909 = vmatprep.subr.mxu1 %v1045_v0  ;;  %419 = vmatpush1.bf16.msra.mxu0 %v952_v15  ;;  %v984_v48 = vld [vmem:[#allocation2 + $0x6c] ss:$16 sps:$4 sm:$0xff]   ;;  %v982_v49 = vld [vmem:[#allocation2 + $0x68] ss:$16 sps:$4 sm:$0xff]  }
  0x1e   :  { %910 = vmatpush3.msra.mxu1 %v125_v16  ;;  %420 = vmatprep.subr.bf16.mxu0 %v957_v17  ;;  %v987_v50 = vld [vmem:[#allocation2 + $0x4c] ss:$16 sps:$4 sm:$0xff]   ;;  %v985_v51 = vld [vmem:[#allocation2 + $0x48] ss:$16 sps:$4 sm:$0xff]  }
  0x1f   :  { %911 = vmatprep.subr.mxu1 %v1045_v0  ;;  %v990_v52 = vld [vmem:[#allocation2 + $0x2c] ss:$16 sps:$4 sm:$0xff]   ;;  %v988_v53 = vld [vmem:[#allocation2 + $0x28] ss:$16 sps:$4 sm:$0xff]  }
  0x20   :  { %912 = vmatpush3.msra.mxu1 %v124_v18  ;;  %v993_v54 = vld [vmem:[#allocation2 + $0xc] ss:$16 sps:$4 sm:$0xff]   ;;  %v991_v55 = vld [vmem:[#allocation2 + $0x8] ss:$16 sps:$4 sm:$0xff]  }
  0x21   :  { %913 = vmatprep.subr.mxu1 %v1045_v0  ;;  %421 = vmatpush1.bf16.msra.mxu0 %v955_v19 }
  0x22   :  { %914 = vmatpush3.msra.mxu1 %v123_v20  ;;  %422 = vmatprep.subr.bf16.mxu0 %v960_v21 }
  0x23   :  { %915 = vmatprep.subr.mxu1 %v1045_v0 }
  0x24   :  { %916 = vmatpush3.msra.mxu1 %v122_v22 }
  0x25   :  { %917 = vmatprep.subr.mxu1 %v1045_v0  ;;  %423 = vmatpush1.bf16.msra.mxu0 %v958_v23 }
  0x26   :  { %918 = vmatpush3.msra.mxu1 %v121_v24  ;;  %424 = vmatprep.subr.bf16.mxu0 %v963_v25 }
  0x27   :  { %919 = vmatprep.subr.mxu1 %v1045_v0 }
  0x28   :  { %920 = vmatpush3.msra.mxu1 %v120_v26 }
  0x29   :  { %921 = vmatprep.subr.mxu1 %v1045_v0  ;;  %425 = vmatpush1.bf16.msra.mxu0 %v961_v27 }
  0x2a   :  { %922 = vmatpush3.msra.mxu1 %v119_v28  ;;  %426 = vmatprep.subr.bf16.mxu0 %v966_v29  ;;  %v685_v29 = vld [vmem:[%s1216_s3] sm:$0xf]  ;;  %s1050_s3 = smov [#allocation5]  }
  0x2b   :  { %923 = vmatprep.subr.mxu1 %v1045_v0  ;;  %s823_s14 = sshll.u32 %s1050_s3, 4  ;;  %s824_s14 = int_to_ptr.vmem [resolvable:$true] %s823_s14 }
  0x2c   :  { %924 = vmatpush3.msra.mxu1 %v118_v30  ;;  %s1018_s15 = scalar_lea.vmem %s824_s14, 128  ;;  %p1023_p6 = scmp.lt.s32.totalorder %s824_s14, %s824_s14 }
  0x2d   :  { %925 = vmatprep.subr.mxu1 %v1045_v0  ;;  %427 = vmatpush1.bf16.msra.mxu0 %v964_v31  ;;  %v573_v31 = vsub.s32 1, %v1175_v6  ;;  %p1019_p5 = scmp.ne.s32.totalorder %s824_s14, %s1018_s15  ;;  %p1024_p7 = scmp.lt.s32.totalorder %s1018_s15, %s1018_s15 }
  0x2e   :  { %926 = vmatpush3.msra.mxu1 %v117_v32  ;;  %428 = vmatprep.subr.bf16.mxu0 %v969_v33  ;;  %v566_v32 = vsub.s32 0, %v1175_v6 }
  0x2f   :  { %927 = vmatprep.subr.mxu1 %v1045_v0  ;;  %p1025_p8 = por %p1024_p7, %p1023_p6 }
  0x30   :  { %928 = vmatpush3.msra.mxu1 %v116_v34 }
  0x31   :  { %429 = vmatpush1.bf16.msra.mxu0 %v967_v35  ;;  %455 = vmatprep.subr.bf16.mxu1 %v972_v36  ;;  %p1026_p9 = pnand %p1025_p8, %p1019_p5 }
  0x32   :  { %932 = vmatprep.subr.mxu0 %v1045_v0 }
  0xd4   :  { %v112_v40 = vpop.f32.mrf.mxu0 }
  0xd5   :  { %v221_v41 = vpack.c.bf16 %v112_v40, %v112_v40  ;;  %930 = vmatmul.mubr.f32.vlgmr.msra.gmra.mxu1 %v112_v40 }
  0xd6   :  { %456 = vmatpush1.bf16.msra.mxu1 %v970_v38  ;;  %v896_v42 = vpop.f32.mrf.mxu0  ;;  %487 = vmatprep.mubr.bf16.mxu1 %v1047_v37  ;;  %v580_v37 = vsub.s32 2, %v1175_v6 }
  0xd7   :  { %447 = vmatmul.mubr.bf16.vlgmr.msra.gmra.mxu0 %v221_v41  ;;  %457 = vmatprep.subr.bf16.mxu1 %v975_v39  ;;  %v587_v39 = vsub.s32 3, %v1175_v6 }
  0xd8   :  { %934 = vmatprep.mubr.msk.f32.mxu0 %vm1046_vm0, %v1045_v0  ;;  %933 = vmatpush3.msk.msra.mxu0 %vm628_vm3, %v685_v29 }
  0xda   :  { %458 = vmatpush1.bf16.msra.mxu1 %v973_v43  ;;  %v601_v43 = vsub.s32 5, %v1175_v6 }
  0xdb   :  { %459 = vmatprep.subr.bf16.mxu1 %v978_v44 }
  0xde   :  { %460 = vmatpush1.bf16.msra.mxu1 %v976_v45  ;;  %v608_v45 = vsub.s32 6, %v1175_v6 }
  0xdf   :  { %461 = vmatprep.subr.bf16.mxu1 %v981_v46 }
  0xe2   :  { %462 = vmatpush1.bf16.msra.mxu1 %v979_v47  ;;  %v615_v47 = vsub.s32 7, %v1175_v6 }
  0xe3   :  { %463 = vmatprep.subr.bf16.mxu1 %v984_v48 }
  0xe6   :  { %464 = vmatpush1.bf16.msra.mxu1 %v982_v49 }
  0xe7   :  { %465 = vmatprep.subr.bf16.mxu1 %v987_v50 }
  0xea   :  { %466 = vmatpush1.bf16.msra.mxu1 %v985_v51 }
  0xeb   :  { %467 = vmatprep.subr.bf16.mxu1 %v990_v52  ;;  %v1049_v52 = vmov 1934713408  }
  0xee   :  { %468 = vmatpush1.bf16.msra.mxu1 %v988_v53  ;;  %v531_v53 = vunpack.c.l.s4 %v1049_v52 }
  0xef   :  { %469 = vmatprep.subr.bf16.mxu1 %v993_v54 }
  0xf2   :  { %470 = vmatpush1.bf16.msra.mxu1 %v991_v55  ;;  %v532_v55 = vunpack.c.0.s8 %v531_v53 }
  0xf5   :  { %488 = vmatmul.mubr.bf16.vlgmr.msra.gmra.mxu1 %v221_v41  ;;  %v594_v41 = vsub.s32 4, %v1175_v6 }
 0x195   :  { %v205_v57 = vpop.f32.mrf.mxu1 }
 0x196   :  { %v206_v58 = vadd.f32 %v833_v56, %v205_v57  ;;  %v535_v56 = vsub.s32 %v532_v55, %v1175_v6 }
 0x197   :  { %v931_v59 = vpop.f32.mrf.mxu1  ;;  %v448_v60 = vpop.f32.mrf.mxu0 }
 0x198   :  { %v210_v61 = vsel %vm209_vm2, %v206_v58, -inf }
 0x199   :  { %211 = vmax.xlane.f32.xlu0 %v210_v61  ;;  %v450_v62 = vpop.f32.mrf.mxu0 }
 0x19b   :  { %v452_v63 = vpop.f32.mrf.mxu0 }
 0x19d   :  { %v453_v1 = vpop.f32.mrf.mxu0 }
 0x1b5   :  { %v489_v7 = vpop.f32.mrf.mxu1 }
 0x1b6   :  { %v496_v8 = vcombine.low %v448_v60, %v489_v7  ;;  %v497_v9 = vcombine.high %v448_v60, %v489_v7 }
 0x1b7   :  { %v491_v11 = vpop.f32.mrf.mxu1 }
 0x1b8   :  { %v512_v12 = vcombine.low %v450_v62, %v491_v11  ;;  %v513_v13 = vcombine.high %v450_v62, %v491_v11  ;;  %v504_v15 = vrot.slane %v496_v8, %v503_v10  ;;  %v1178_v16 = vrot.slane %v497_v9, %v503_v10 }
 0x1b9   :  { %v493_v14 = vpop.f32.mrf.mxu1 }
 0x1ba   :  { %v520_v17 = vrot.slane %v512_v12, %v503_v10  ;;  %v527_v18 = vrot.slane %v513_v13, %v503_v10 }
 0x1bb   :  { %v494_v19 = vpop.f32.mrf.mxu1 }
 0x1bc   :  { %v528_v20 = vcombine.low %v504_v15, %v520_v17  ;;  %v529_v21 = vcombine.high %v504_v15, %v520_v17  ;;  %v544_v22 = vcombine.low %v1178_v16, %v527_v18  ;;  %v545_v23 = vcombine.high %v1178_v16, %v527_v18 }
 0x1be   :  { %v543_v59 = vrot.slane %v529_v21, %v535_v56  ;;  %v552_v62 = vrot.slane %v544_v22, %v535_v56  ;;  %v559_v2 = vrot.slane %v545_v23, %v535_v56 }
 0x1c0   :  { %v561_v1 = vcombine.high %v543_v59, %v1045_v0  ;;  %v562_v8 = vcombine.high %v552_v62, %v1045_v0  ;;  %v563_v11 = vcombine.high %v559_v2, %v1045_v0 }
 0x222   :  { %v212_v24 = vpop.xlane.xlu0 %211 }
 0x223   :  { %v213_v25 = vsub.f32 %v206_v58, %v212_v24  ;;  %v536_v58 = vrot.slane %v528_v20, %v535_v56 }
 0x225   :  { %v214_v26 = vmul.f32 1.442695, %v213_v25  ;;  %v560_v63 = vcombine.high %v536_v58, %v1045_v0 }
 0x227   :  { %994 = vpow2.f32 %v214_v26 }
 0x234   :  { %v995_v27 = vpop.eup %994 }
 0x235   :  { %v216_v28 = vsel %vm209_vm2, %v995_v27, 0.0 }
 0x236   :  { %217 = vadd.xlane.f32.xlu0 %v216_v28 }
 0x2bf   :  { %v218_v30 = vpop.xlane.xlu0 %217 }
 0x2c0   :  { %996 = vrcp.f32 %v218_v30 }
 0x2cd   :  { %v997_v33 = vpop.eup %996 }
 0x2ce   :  { %v220_v34 = vmul.f32 %v997_v33, %v995_v27 }
 0x2d0   :  { %935 = vmatmul.mubr.msk.f32.vlgmr.msra.gmra.mxu0 %vm209_vm2, %v220_v34  ;;  %v574_v35 = vrot.slane %v220_v34, %v573_v31  ;;  %v567_v36 = vrot.slane %v220_v34, %v566_v32  ;;  %v581_v38 = vrot.slane %v220_v34, %v580_v37  ;;  %v588_v40 = vrot.slane %v220_v34, %v587_v39 }
 0x2d1   :  { %v595_v42 = vrot.slane %v220_v34, %v594_v41  ;;  %v602_v44 = vrot.slane %v220_v34, %v601_v43  ;;  %v609_v46 = vrot.slane %v220_v34, %v608_v45  ;;  %v616_v48 = vrot.slane %v220_v34, %v615_v47 }
 0x2d2   :  { %576 = vbcast.lane.b32.xlu1 %v574_v35, 256  ;;  %569 = vbcast.lane.b32.xlu0 %v567_v36, 256 }
 0x2d6   :  { %583 = vbcast.lane.b32.xlu1 %v581_v38, 256 }
 0x2da   :  { %590 = vbcast.lane.b32.xlu1 %v588_v40, 256 }
 0x2de   :  { %597 = vbcast.lane.b32.xlu1 %v595_v42, 256 }
 0x2e2   :  { %604 = vbcast.lane.b32.xlu1 %v602_v44, 256 }
 0x2e6   :  { %611 = vbcast.lane.b32.xlu1 %v609_v46, 256 }
 0x2ea   :  { %618 = vbcast.lane.b32.xlu1 %v616_v48, 256 }
 0x344   :  { %v577_v49 = vpop.permute.xlu1 %576  ;;  %v570_v61 = vpop.permute.xlu0 %569 }
 0x345   :  { %v621_v3 = vmul.f32 %v577_v49, %v560_v63  ;;  %v620_v4 = vmul.f32 %v570_v61, %v536_v58 }
 0x347   :  { %v636_v12 = vsel %vm628_vm3, %v621_v3, 0.0  ;;  %v629_v13 = vsel %vm628_vm3, %v620_v4, 0.0 }
 0x348   :  { %v584_v50 = vpop.permute.xlu1 %583  ;;  %v637_v19 = vrot.slane %v636_v12, 4  ;;  %v630_v20 = vrot.slane %v629_v13, 4 }
 0x349   :  { %v622_v5 = vmul.f32 %v584_v50, %v543_v59 }
 0x34a   :  { %v638_v27 = vadd.f32 %v637_v19, %v636_v12  ;;  %v631_v28 = vadd.f32 %v630_v20, %v629_v13 }
 0x34b   :  { %v643_v14 = vsel %vm628_vm3, %v622_v5, 0.0 }
 0x34c   :  { %v591_v51 = vpop.permute.xlu1 %590  ;;  %v644_v22 = vrot.slane %v643_v14, 4  ;;  %v639_v35 = vrot.slane %v638_v27, 2  ;;  %v632_v36 = vrot.slane %v631_v28, 2 }
 0x34d   :  { %v623_v7 = vmul.f32 %v591_v51, %v561_v1 }
 0x34e   :  { %v645_v29 = vadd.f32 %v644_v22, %v643_v14  ;;  %v640_v43 = vadd.f32 %v639_v35, %v638_v27  ;;  %v633_v44 = vadd.f32 %v632_v36, %v631_v28 }
 0x34f   :  { %v650_v15 = vsel %vm628_vm3, %v623_v7, 0.0 }
 0x350   :  { %v598_v54 = vpop.permute.xlu1 %597  ;;  %v651_v23 = vrot.slane %v650_v15, 4  ;;  %v646_v37 = vrot.slane %v645_v29, 2  ;;  %v641_v51 = vrot.slane %v640_v43, 1  ;;  %v634_v52 = vrot.slane %v633_v44, 1 }
 0x351   :  { %v624_v9 = vmul.f32 %v598_v54, %v552_v62 }
 0x352   :  { %v652_v30 = vadd.f32 %v651_v23, %v650_v15  ;;  %v647_v45 = vadd.f32 %v646_v37, %v645_v29  ;;  %v642_v59 = vadd.f32 %v641_v51, %v640_v43 }
 0x353   :  { %v657_v18 = vsel %vm628_vm3, %v624_v9, 0.0 }
 0x354   :  { %v605_v57 = vpop.permute.xlu1 %604  ;;  %v658_v24 = vrot.slane %v657_v18, 4  ;;  %v653_v38 = vrot.slane %v652_v30, 2  ;;  %v648_v53 = vrot.slane %v647_v45, 1 }
 0x355   :  { %v625_v6 = vmul.f32 %v605_v57, %v562_v8 }
 0x356   :  { %v659_v33 = vadd.f32 %v658_v24, %v657_v18  ;;  %v654_v46 = vadd.f32 %v653_v38, %v652_v30  ;;  %v649_v61 = vadd.f32 %v648_v53, %v647_v45 }
 0x357   :  { %v664_v21 = vsel %vm628_vm3, %v625_v6, 0.0 }
 0x358   :  { %v612_v60 = vpop.permute.xlu1 %611  ;;  %v665_v26 = vrot.slane %v664_v21, 4  ;;  %v660_v41 = vrot.slane %v659_v33, 2  ;;  %v655_v54 = vrot.slane %v654_v46, 1 }
 0x359   :  { %v626_v16 = vmul.f32 %v612_v60, %v559_v2  ;;  %v635_v60 = vadd.f32 %v634_v52, %v633_v44 }
 0x35a   :  { %v666_v34 = vadd.f32 %v665_v26, %v664_v21  ;;  %v661_v49 = vadd.f32 %v660_v41, %v659_v33  ;;  %v656_v62 = vadd.f32 %v655_v54, %v654_v46 }
 0x35b   :  { %v671_v0 = vsel %vm628_vm3, %v626_v16, 0.0 }
 0x35c   :  { %v619_v10 = vpop.permute.xlu1 %618  ;;  %v672_v31 = vrot.slane %v671_v0, 4  ;;  %v667_v42 = vrot.slane %v666_v34, 2  ;;  %v662_v57 = vrot.slane %v661_v49, 1 }
 0x35d   :  { %v627_v17 = vmul.f32 %v619_v10, %v563_v11 }
 0x35e   :  { %v673_v39 = vadd.f32 %v672_v31, %v671_v0  ;;  %v668_v50 = vadd.f32 %v667_v42, %v666_v34  ;;  %v663_v3 = vadd.f32 %v662_v57, %v661_v49 }
 0x35f   :  { %v678_v25 = vsel %vm628_vm3, %v627_v17, 0.0 }
 0x360   :  { %v679_v32 = vrot.slane %v678_v25, 4  ;;  %v674_v47 = vrot.slane %v673_v39, 2  ;;  %v669_v58 = vrot.slane %v668_v50, 1 }
 0x362   :  { %v680_v40 = vadd.f32 %v679_v32, %v678_v25  ;;  %v675_v55 = vadd.f32 %v674_v47, %v673_v39  ;;  %v670_v8 = vadd.f32 %v669_v58, %v668_v50 }
 0x364   :  { %v681_v48 = vrot.slane %v680_v40, 2  ;;  %v676_v63 = vrot.slane %v675_v55, 1 }
 0x366   :  { %v682_v56 = vadd.f32 %v681_v48, %v680_v40  ;;  %v677_v16 = vadd.f32 %v676_v63, %v675_v55 }
 0x368   :  { %v683_v1 = vrot.slane %v682_v56, 1 }
 0x36a   :  { %v684_v17 = vadd.f32 %v683_v1, %v682_v56 }
 0x390   :  { %v758_v2 = vpop.f32.mrf.mxu0 }
 0x391   :  { %v763_v4 = vrot.slane %v758_v2, 1  ;;  %v764_v5 = vrot.slane %v758_v2, 2  ;;  %v765_v7 = vrot.slane %v758_v2, 3  ;;  %v766_v10 = vrot.slane %v758_v2, 4 }
 0x392   :  { %v936_v9 = vpop.f32.mrf.mxu0  ;;  %v767_v6 = vrot.slane %v758_v2, 5  ;;  %v768_v11 = vrot.slane %v758_v2, 6  ;;  %v769_v12 = vrot.slane %v758_v2, 7  ;;  %v778_v19 = vadd.f32 %v758_v2, %v635_v60 }
 0x393   :  { %v779_v13 = vadd.f32 %v763_v4, %v642_v59  ;;  %v780_v14 = vadd.f32 %v764_v5, %v649_v61  ;;  %v781_v15 = vadd.f32 %v765_v7, %v656_v62  ;;  %v782_v18 = vadd.f32 %v766_v10, %v663_v3 }
 0x394   :  { %v783_v20 = vadd.f32 %v767_v6, %v670_v8  ;;  %v784_v23 = vadd.f32 %v768_v11, %v677_v16  ;;  %v785_v24 = vadd.f32 %v769_v12, %v684_v17 }
 0x395   :  { %v794_v21 = vrot.slane %v779_v13, 7  ;;  %v797_v22 = vrot.slane %v780_v14, 6  ;;  %v800_v25 = vrot.slane %v781_v15, 5  ;;  %v803_v27 = vrot.slane %v782_v18, 4 }
 0x396   :  { %v806_v29 = vrot.slane %v783_v20, 3  ;;  %v809_v31 = vrot.slane %v784_v23, 2  ;;  %v812_v33 = vrot.slane %v785_v24, 1 }
 0x397   :  { %v796_v0 = vsel %vm795_vm4, %v794_v21, %v778_v19 }
 0x398   :  { %v799_v26 = vsel %vm798_vm5, %v797_v22, %v796_v0 }
 0x399   :  { %v802_v28 = vsel %vm801_vm6, %v800_v25, %v799_v26 }
 0x39a   :  { %v805_v30 = vsel %vm804_vm7, %v803_v27, %v802_v28 }
 0x39b   :  { %v808_v32 = vsel %vm807_vm8, %v806_v29, %v805_v30 }
 0x39c   :  { %v811_v34 = vsel %vm810_vm9, %v809_v31, %v808_v32 }
 0x39d   :  { %v814_v35 = vsel %vm813_vm10, %v812_v33, %v811_v34 }
 0x39e   :  { %816 = vst [vmem:[#allocation5] sm:$0xff] %v814_v35 }
 0x39f   :  { %1029 = shalt.err (!%p1026_p9)
}
 0x3a0   :  { %826 = dma.vmem_to_hbm [thread:$0]  %s824_s14, 128, %s1219_s6, [#allocation4]  }
 0x3a1   :  { %1040 = dma.done.wait [#allocation4], 128  }
 0x3a2   :  { %1041 = vsyncadd [#allocation4], 4294967168 }
 0x3a3   :  { %830 = vsyncpa [#allocation3], 1 }
 0x3a4   :  { %831 = vsyncpa [#allocation4], 1 }

</bundles_post_ra>
